<compile_context>
chip_gen: v7x
topology: tpu7x:2x2x1
jax: 0.10.0
libtpu: 0.0.40
codegen_flags: <defaults>
</compile_context>

<pallas_src>
import functools

import jax
import jax.numpy as jnp
from jax import lax
from jax.experimental import pallas as pl
from jax.experimental.pallas import tpu as pltpu


def _round_up(x, m):
    return (x + m - 1) // m * m


def _pad_to(x, *target):
    pads = [(0, t - s) for s, t in zip(x.shape, target)]
    if all(p == (0, 0) for p in pads):
        return x
    return jnp.pad(x, pads)


# ----------------------------------------------------------------------------
# Generation-aware VMEM budgeting (v5e/v6e: 128 MiB physical, v7x: 64 MiB).
# ----------------------------------------------------------------------------
def _vmem_capacity_bytes():
    try:
        info = pltpu.get_tpu_info()
        for name in ("vmem_capacity_bytes", "vmem_size_bytes"):
            cap = getattr(info, name, None)
            if cap:
                return int(cap)
    except Exception:
        pass
    return 64 * 1024 * 1024  # conservative fallback (v7x-sized)


_VMEM_CAP = _vmem_capacity_bytes()
# Scoped-VMEM limit handed to Mosaic: generous on 128 MiB parts, <=48 MiB on v7x.
VMEM_LIMIT_BYTES = min(96 * 1024 * 1024, (_VMEM_CAP * 3) // 4)
# Row tile for the output projection: big M tile so W_out is only re-streamed
# Mp/tm times. tm=2048 needs ~13-22 MiB double-buffered -> fine on 128 MiB parts;
# use 1024 on 64 MiB parts (v7x) for headroom.
OUT_PROJ_TM = 2048 if _VMEM_CAP >= 100 * 1024 * 1024 else 1024

# Default matmul tiles (per-call overridable).
MM_TM, MM_TN, MM_TK = 512, 512, 512

# Time steps processed per recurrence grid iteration.
TIME_TILE = 32


# ----------------------------------------------------------------------------
# Tiled matmul + bias:  out = x @ w + b
#   - K-reduction variant (grid = M/tm, N/tn, K/tk) with f32 acc scratch
#   - single-K variant (grid = M/tm, N/tn) with no scratch / no reduction axis
# ----------------------------------------------------------------------------
def _matmul_bias_kernel_kloop(x_ref, w_ref, b_ref, o_ref, acc_ref):
    @pl.when(pl.program_id(2) == 0)
    def _():
        acc_ref[...] = jnp.zeros_like(acc_ref)

    acc_ref[...] += jnp.dot(x_ref[...], w_ref[...],
                            preferred_element_type=jnp.float32)

    @pl.when(pl.program_id(2) == pl.num_programs(2) - 1)
    def _():
        o_ref[...] = (acc_ref[...] + b_ref[...].astype(jnp.float32)).astype(o_ref.dtype)


def _matmul_bias_kernel_single_k(x_ref, w_ref, b_ref, o_ref):
    o_ref[...] = (jnp.dot(x_ref[...], w_ref[...], preferred_element_type=jnp.float32)
                  + b_ref[...].astype(jnp.float32)).astype(o_ref.dtype)


def tiled_matmul_bias(x, w, b, *, out_dtype=jnp.float32,
                      tm=MM_TM, tn=MM_TN, tk=MM_TK):
    """out[:M, :N] = x @ w + b  (internally pads every dim to its tile size)."""
    M, K = x.shape
    K2, N = w.shape
    assert K == K2
    b = b.reshape(1, -1)

    tm = min(tm, _round_up(M, 8))
    tn = min(tn, _round_up(N, 128))
    tk = min(tk, _round_up(K, 128))
    Mp, Kp, Np = _round_up(M, tm), _round_up(K, tk), _round_up(N, tn)

    xp = _pad_to(x, Mp, Kp)
    wp = _pad_to(w, Kp, Np)
    bp = _pad_to(b, 1, Np)

    if Kp // tk == 1:
        # Whole K fits one tile: skip accumulator scratch and the reduction axis.
        out = pl.pallas_call(
            _matmul_bias_kernel_single_k,
            out_shape=jax.ShapeDtypeStruct((Mp, Np), out_dtype),
            grid_spec=pltpu.PrefetchScalarGridSpec(
                num_scalar_prefetch=0,
                grid=(Mp // tm, Np // tn),
                in_specs=[pl.BlockSpec((tm, Kp), lambda i, j: (i, 0)),
                          pl.BlockSpec((Kp, tn), lambda i, j: (0, j)),
                          pl.BlockSpec((1, tn), lambda i, j: (0, j))],
                out_specs=pl.BlockSpec((tm, tn), lambda i, j: (i, j))),
            compiler_params=pltpu.CompilerParams(
                dimension_semantics=("parallel", "parallel"),
                vmem_limit_bytes=VMEM_LIMIT_BYTES),
        )(xp, wp, bp)
    else:
        out = pl.pallas_call(
            _matmul_bias_kernel_kloop,
            out_shape=jax.ShapeDtypeStruct((Mp, Np), out_dtype),
            grid_spec=pltpu.PrefetchScalarGridSpec(
                num_scalar_prefetch=0,
                grid=(Mp // tm, Np // tn, Kp // tk),
                in_specs=[pl.BlockSpec((tm, tk), lambda i, j, k: (i, k)),
                          pl.BlockSpec((tk, tn), lambda i, j, k: (k, j)),
                          pl.BlockSpec((1, tn), lambda i, j, k: (0, j))],
                out_specs=pl.BlockSpec((tm, tn), lambda i, j, k: (i, j)),
                scratch_shapes=[pltpu.VMEM((tm, tn), jnp.float32)]),
            compiler_params=pltpu.CompilerParams(
                dimension_semantics=("parallel", "parallel", "arbitrary"),
                vmem_limit_bytes=VMEM_LIMIT_BYTES),
        )(xp, wp, bp)
    return out[:M, :N]


# ----------------------------------------------------------------------------
# LSTM recurrence kernel.  Grid over time tiles ("arbitrary"); h/c VMEM scratch
# persists across grid steps.  Per step only h_prev @ W_hh^T hits the MXU; the
# input projection (incl. bias) is already folded into xg (bf16).
# ----------------------------------------------------------------------------
def _lstm_recurrence_kernel(xg_ref, whh_ref, h_out_ref, h_scr, c_scr,
                            *, hidden, steps, unroll):
    @pl.when(pl.program_id(0) == 0)
    def _():
        h_scr[...] = jnp.zeros_like(h_scr)
        c_scr[...] = jnp.zeros_like(c_scr)

    H = hidden

    def step(t, carry):
        h_prev = h_scr[...]                                    # (Bp, Hp) f32
        gates = (xg_ref[t].astype(jnp.float32)                 # (Bp, 4Hp) precomputed
                 + jnp.dot(h_prev.astype(whh_ref.dtype), whh_ref[...],
                           preferred_element_type=jnp.float32))
        # PyTorch gate order: i, f, g, o  (slices at 128-aligned offsets).
        # i and f go through one sigmoid launch on a contiguous slab.
        if_g = jax.nn.sigmoid(gates[:, 0:2 * H])
        i_g = if_g[:, 0:H]
        f_g = if_g[:, H:2 * H]
        g_g = jnp.tanh(gates[:, 2 * H:3 * H])
        o_g = jax.nn.sigmoid(gates[:, 3 * H:4 * H])
        c_new = f_g * c_scr[...] + i_g * g_g
        h_new = o_g * jnp.tanh(c_new)
        c_scr[...] = c_new
        h_scr[...] = h_new
        h_out_ref[t] = h_new.astype(h_out_ref.dtype)           # lane-dense (Bp, Hp) store
        return carry

    # Partial unroll keeps LLO scheduling visibility without vreg-spill risk.
    lax.fori_loop(0, steps, step, 0, unroll=unroll)


# ----------------------------------------------------------------------------
# Full forward pass of LM_LSTM_0.
# ----------------------------------------------------------------------------
def lm_lstm_forward(input_ids, params, *, compute_dtype=jnp.bfloat16):
    """Returns (B, V, T) float32 logits, matching PyTorch LM_LSTM_0.forward."""
    emb_table = params["emb"]                 # (V, E)
    w_ih = params["w_ih"]                     # (4H, E)
    w_hh = params["w_hh"]                     # (4H, H)
    b_gate = params["b_ih"] + params["b_hh"]  # (4H,)
    w_out = params["w_out"]                   # (V, H)
    b_out = params["b_out"]                   # (V,)

    B, T = input_ids.shape
    V, E = emb_table.shape
    H = w_hh.shape[1]

    # ---- padded, (8,128)-aligned sizes --------------------------------------
    Bp = _round_up(B, 8)
    Ep = _round_up(E, 128)
    Hp = _round_up(H, 128)
    Vp = _round_up(V, 128)
    Tt = min(TIME_TILE, T)
    Tp = _round_up(T, Tt)

    # ---- pad parameters (per-gate padding keeps i/f/g/o blocks 128-aligned) --
    def pad_gate_mat(w, in_dim, in_dim_p):          # (4H, in) -> (4Hp, in_p)
        w4 = w.reshape(4, H, in_dim)
        w4 = jnp.pad(w4, ((0, 0), (0, Hp - H), (0, in_dim_p - in_dim)))
        return w4.reshape(4 * Hp, in_dim_p)

    wih_t = jnp.transpose(pad_gate_mat(w_ih, E, Ep)).astype(compute_dtype)   # (Ep, 4Hp)
    whh_t = jnp.transpose(pad_gate_mat(w_hh, H, Hp)).astype(compute_dtype)   # (Hp, 4Hp)
    b_p = jnp.pad(b_gate.reshape(4, H), ((0, 0), (0, Hp - H))).reshape(4 * Hp)
    b_p = b_p.astype(jnp.float32)                                            # (4Hp,)
    wout_t = jnp.transpose(_pad_to(w_out, Vp, Hp)).astype(compute_dtype)     # (Hp, Vp)
    bout_p = _pad_to(b_out, Vp).astype(jnp.float32)                          # (Vp,)

    # ---- glue: embedding gather directly in time-major (T, B, E) -------------
    emb_tbe = jnp.take(emb_table, input_ids.T, axis=0)            # (T, B, E)
    emb_tbe = _pad_to(emb_tbe, Tp, Bp, Ep).astype(compute_dtype)  # (Tp, Bp, Ep)

    # ---- 1) input projection for ALL timesteps (one big MXU matmul, bf16 out) -
    xg_flat = tiled_matmul_bias(emb_tbe.reshape(Tp * Bp, Ep), wih_t, b_p,
                                out_dtype=compute_dtype)          # (Tp*Bp, 4Hp) bf16
    xg = xg_flat.reshape(Tp, Bp, 4 * Hp)

    # ---- 2) sequential recurrence, gridded over time tiles -------------------
    unroll = max(1, min(8, Tt))
    h_all = pl.pallas_call(
        functools.partial(_lstm_recurrence_kernel, hidden=Hp, steps=Tt,
                          unroll=unroll),
        out_shape=jax.ShapeDtypeStruct((Tp, Bp, Hp), compute_dtype),
        grid_spec=pltpu.PrefetchScalarGridSpec(
            num_scalar_prefetch=0,
            grid=(Tp // Tt,),
            in_specs=[pl.BlockSpec((Tt, Bp, 4 * Hp), lambda t: (t, 0, 0)),
                      pl.BlockSpec((Hp, 4 * Hp), lambda t: (0, 0))],
            out_specs=pl.BlockSpec((Tt, Bp, Hp), lambda t: (t, 0, 0)),
            scratch_shapes=[pltpu.VMEM((Bp, Hp), jnp.float32),   # h state
                            pltpu.VMEM((Bp, Hp), jnp.float32)],  # c state
        ),
        compiler_params=pltpu.CompilerParams(
            dimension_semantics=("arbitrary",),
            vmem_limit_bytes=VMEM_LIMIT_BYTES),
    )(xg, whh_t)

    # ---- 3) output projection: big row tile -> W_out streamed Mp/tm times only -
    logits_flat = tiled_matmul_bias(h_all.reshape(Tp * Bp, Hp), wout_t, bout_p,
                                    out_dtype=jnp.float32,
                                    tm=OUT_PROJ_TM, tn=512)       # (Tp*Bp, Vp)
    logits = logits_flat.reshape(Tp, Bp, Vp)[:T, :B, :V]          # (T, B, V)

    # (T, B, V) -> (B, V, T)  ==  PyTorch .permute(0, 2, 1) of (B, T, V).
    # Kept as plain-JAX: fusing it into the projection kernel is only lane-dense
    # (unmasked stores) when T >= 128.
    return jnp.transpose(logits, (1, 2, 0))


# ----------------------------------------------------------------------------
# Pure-JAX f32 reference (mirrors PyTorch semantics) for correctness check.
# ----------------------------------------------------------------------------
def ref_forward(input_ids, params):
    emb = params["emb"][input_ids]                               # (B, T, E)
    B = input_ids.shape[0]
    H = params["w_hh"].shape[1]

    def cell(carry, x_t):
        h, c = carry
        gates = (x_t @ params["w_ih"].T + params["b_ih"]
                 + h @ params["w_hh"].T + params["b_hh"])
        i, f, g, o = jnp.split(gates, 4, axis=-1)
        c = jax.nn.sigmoid(f) * c + jax.nn.sigmoid(i) * jnp.tanh(g)
        h = jax.nn.sigmoid(o) * jnp.tanh(c)
        return (h, c), h

    init = (jnp.zeros((B, H), jnp.float32), jnp.zeros((B, H), jnp.float32))
    _, hs = lax.scan(cell, init, jnp.transpose(emb, (1, 0, 2)))   # (T, B, H)
    logits = hs @ params["w_out"].T + params["b_out"]             # (T, B, V)
    return jnp.transpose(logits, (1, 2, 0))                       # (B, V, T)


def init_params(key, emb_size, hidden_size, output_size, pad_index=0):
    ks = jax.random.split(key, 7)
    k = 1.0 / jnp.sqrt(hidden_size)
    emb = jax.random.normal(ks[0], (output_size, emb_size), jnp.float32)
    emb = emb.at[pad_index].set(0.0)   # nn.Embedding zeroes the padding_idx row
    return {
        "emb": emb,
        "w_ih": jax.random.uniform(ks[1], (4 * hidden_size, emb_size), jnp.float32, -k, k),
        "w_hh": jax.random.uniform(ks[2], (4 * hidden_size, hidden_size), jnp.float32, -k, k),
        "b_ih": jax.random.uniform(ks[3], (4 * hidden_size,), jnp.float32, -k, k),
        "b_hh": jax.random.uniform(ks[4], (4 * hidden_size,), jnp.float32, -k, k),
        "w_out": jax.random.uniform(ks[5], (output_size, hidden_size), jnp.float32, -k, k),
        "b_out": jax.random.uniform(ks[6], (output_size,), jnp.float32, -k, k),
    }


if __name__ == "__main__":
    B, T = 2, 8
    EMB, HID, VOCAB = 32, 32, 64

    key = jax.random.PRNGKey(0)
    k_params, k_ids = jax.random.split(key)
    params = init_params(k_params, EMB, HID, VOCAB, pad_index=0)
    input_ids = jax.random.randint(k_ids, (B, T), 0, VOCAB, dtype=jnp.int32)

    out = lm_lstm_forward(input_ids, params, compute_dtype=jnp.bfloat16)
    out = jax.block_until_ready(out)

    expected = jax.block_until_ready(ref_forward(input_ids, params))
    assert out.shape == (B, VOCAB, T), out.shape
    # bf16 MXU operands / bf16 xg with f32 accumulation -> loosened tolerance.
    assert jnp.allclose(out, expected, rtol=2e-2, atol=2e-2), \
        float(jnp.max(jnp.abs(out - expected)))

    print("KERNEL_OK")
</pallas_src>

<mosaic_0001>
module attributes {stable_mosaic.version = 11 : i64} {
  func.func @_matmul_bias_kernel_single_k(%arg0: i32, %arg1: i32, %arg2: memref<64x128xbf16, #tpu.memory_space<vmem>>, %arg3: memref<128x512xbf16, #tpu.memory_space<vmem>>, %arg4: memref<1x512xf32, #tpu.memory_space<vmem>>, %arg5: memref<64x512xbf16, #tpu.memory_space<vmem>>) attributes {dimension_semantics = [#tpu.dimension_semantics<parallel>, #tpu.dimension_semantics<parallel>], iteration_bounds = array<i64: 1, 1>, scalar_prefetch = 0 : i64, scratch_operands = 0 : i64, tpu.core_type = #tpu.core_type<tc>, window_params = [{transform_indices = @transform_0, window_bounds = array<i64: 64, 128>}, {transform_indices = @transform_1, window_bounds = array<i64: 128, 512>}, {transform_indices = @transform_2, window_bounds = array<i64: 1, 512>}, {transform_indices = @transform_3, window_bounds = array<i64: 64, 512>}]} {
    %c0 = arith.constant 0 : index
    %c0_0 = arith.constant 0 : index
    %0 = vector.load %arg2[%c0, %c0_0] : memref<64x128xbf16, #tpu.memory_space<vmem>>, vector<64x128xbf16>
    %c0_1 = arith.constant 0 : index
    %c0_2 = arith.constant 0 : index
    %1 = vector.load %arg3[%c0_1, %c0_2] : memref<128x512xbf16, #tpu.memory_space<vmem>>, vector<128x512xbf16>
    %cst = arith.constant dense<0.000000e+00> : vector<64x512xf32>
    %2 = tpu.matmul %0, %1, %cst {dimension_numbers = #tpu.dot_dimension_numbers<[1], [0], [0], [1], [0, 0, 1, 1], [], []>} : vector<64x128xbf16>, vector<128x512xbf16>, vector<64x512xf32> -> vector<64x512xf32>
    %c0_3 = arith.constant 0 : index
    %c0_4 = arith.constant 0 : index
    %3 = vector.load %arg4[%c0_3, %c0_4] : memref<1x512xf32, #tpu.memory_space<vmem>>, vector<1x512xf32>
    %4 = vector.broadcast %3 : vector<1x512xf32> to vector<64x512xf32>
    %5 = arith.addf %2, %4 : vector<64x512xf32>
    %6 = arith.truncf %5 : vector<64x512xf32> to vector<64x512xbf16>
    %c0_5 = arith.constant 0 : index
    %c0_6 = arith.constant 0 : index
    %7 = vector.load %arg5[%c0_5, %c0_6] : memref<64x512xbf16, #tpu.memory_space<vmem>>, vector<64x512xbf16>
    tpu.vector_store %arg5[%c0_5, %c0_6], %6 {strides = array<i32>} : memref<64x512xbf16, #tpu.memory_space<vmem>>, vector<64x512xbf16>,
    return
  }
  func.func @transform_0(%arg0: i32, %arg1: i32) -> (i32, i32) {
    %c0_i32 = arith.constant 0 : i32
    %c0_i32_0 = arith.constant 0 : i32
    return %arg0, %c0_i32 : i32, i32
  }
  func.func @transform_1(%arg0: i32, %arg1: i32) -> (i32, i32) {
    %c0_i32 = arith.constant 0 : i32
    %c0_i32_0 = arith.constant 0 : i32
    return %c0_i32, %arg1 : i32, i32
  }
  func.func @transform_2(%arg0: i32, %arg1: i32) -> (i32, i32) {
    %c0_i32 = arith.constant 0 : i32
    %c0_i32_0 = arith.constant 0 : i32
    return %c0_i32, %arg1 : i32, i32
  }
  func.func @transform_3(%arg0: i32, %arg1: i32) -> (i32, i32) {
    %c0_i32 = arith.constant 0 : i32
    return %arg0, %arg1 : i32, i32
  }
}

</mosaic_0001>

<bundles_post_ra>
// kernel: tpu_custom_call.1
= control target key start
LH: loop header
LB: loop body
LE: loop exit
PB: predicated region body
PF: predicated region fallthrough
CT: control target
= control target key end

     0   :  { %8 = vsyncpa [#allocation3], 0  ;;  %s887_s0 = inlined_call_operand.hbm [shape: bf16[64,128], index: 0, kind: input, shape index: {}]   ;;  %s888_s1 = inlined_call_operand.hbm [shape: bf16[128,512], index: 1, kind: input, shape index: {}]   ;;  %s889_s2 = inlined_call_operand.vmem [shape: f32[1,512], index: 2, kind: input, shape index: {}]   ;;  %s890_s3 = inlined_call_operand.hbm [shape: bf16[64,512], index: 3, kind: output, shape index: {}]  }
   0x1   :  { %9 = vsyncpa [#allocation6], 0 }
   0x2   :  { %10 = vsyncpa [#allocation4], 0  ;;  %s766_s12 = smov [#allocation2]   ;;  %s694_s16 = scalar_lea.hbm %s887_s0, 512 }
   0x3   :  { %s16_s13 = sshll.u32 %s766_s12, 4  ;;  %p695_p0 = scmp.ne.s32.totalorder %s887_s0, %s694_s16  ;;  %s17_s13 = int_to_ptr.vmem [resolvable:$true] %s16_s13 }
   0x4   :  { %p698_p1 = scmp.lt.u32.totalorder %s694_s16, %s887_s0 }
   0x6   :  { %p700_p2 = pnand %p698_p1, %p695_p0 }
   0x8   :  { %703 = shalt.err (!%p700_p2)
}
   0x9   :  { %s704_s21 = scalar_lea.vmem %s17_s13, 512  ;;  %p709_p4 = scmp.lt.s32.totalorder %s17_s13, %s17_s13 }
   0xa   :  { %p705_p3 = scmp.ne.s32.totalorder %s17_s13, %s704_s21  ;;  %p710_p5 = scmp.lt.s32.totalorder %s704_s21, %s704_s21 }
   0xc   :  { %p711_p6 = por %p710_p5, %p709_p4 }
   0xe   :  { %p712_p7 = pnand %p711_p6, %p705_p3 }
  0x10   :  { %715 = shalt.err (!%p712_p7)
}
  0x11   :  { %s767_s22 = smov 64   ;;  %s768_s23 = smov 4  }
  0x12   :  { %22 = dma.hbm_to_vmem [thread:$0]  %s887_s0, 512, %s17_s13, [#allocation3], %s767_s22, %s767_s22, %s768_s23  }
  0x13   :  { %s769_s26 = smov [#allocation5]   ;;  %s716_s30 = scalar_lea.hbm %s888_s1, 4096 }
  0x14   :  { %s28_s27 = sshll.u32 %s769_s26, 4  ;;  %p717_p8 = scmp.ne.s32.totalorder %s888_s1, %s716_s30  ;;  %s29_s27 = int_to_ptr.vmem [resolvable:$true] %s28_s27 }
  0x15   :  { %p720_p9 = scmp.lt.u32.totalorder %s716_s30, %s888_s1 }
  0x17   :  { %p722_p10 = pnand %p720_p9, %p717_p8 }
  0x19   :  { %725 = shalt.err (!%p722_p10)
}
  0x1a   :  { %s726_s8 = scalar_lea.vmem %s29_s27, 4096  ;;  %p731_p12 = scmp.lt.s32.totalorder %s29_s27, %s29_s27 }
  0x1b   :  { %p727_p11 = scmp.ne.s32.totalorder %s29_s27, %s726_s8  ;;  %p732_p13 = scmp.lt.s32.totalorder %s726_s8, %s726_s8 }
  0x1d   :  { %p733_p0 = por %p732_p13, %p731_p12 }
  0x1f   :  { %p734_p1 = pnand %p733_p0, %p727_p11 }
  0x21   :  { %737 = shalt.err (!%p734_p1)
}
  0x22   :  { %s770_s0 = smov 256   ;;  %s771_s9 = smov 16  }
  0x23   :  { %34 = dma.hbm_to_vmem [thread:$0]  %s888_s1, 4096, %s29_s27, [#allocation6], %s770_s0, %s770_s0, %s771_s9  }
  0x24   :  { %760 = dma.done.wait [#allocation3], 512  }
  0x25   :  { %761 = vsyncadd [#allocation3], 4294966784 }
  0x26   :  { %762 = dma.done.wait [#allocation6], 4096  }
  0x27   :  { %763 = vsyncadd [#allocation6], 4294963200  ;;  %v772_v0 = vmov 0   ;;  %v642_v1 = vld [vmem:[#allocation5 + $0x4] ss:$16 sps:$4 sm:$0xff]   ;;  %v691_v34 = vld [vmem:[#allocation2 + $0x8] sm:$0xff]   ;;  %v86_v37 = vlaneseq }
  0x28   :  { %322 = vmatprep.mubr.bf16.mxu0 %v772_v0  ;;  %395 = vmatprep.mubr.bf16.mxu1 %v772_v0  ;;  %v644_v2 = vld [vmem:[#allocation5 + $0xc] ss:$16 sps:$4 sm:$0xff]   ;;  %v646_v3 = vld [vmem:[#allocation5] ss:$16 sps:$4 sm:$0xff]   ;;  %v647_v4 = vld [vmem:[#allocation5 + $0x8] ss:$16 sps:$4 sm:$0xff]  }
  0x29   :  { %290 = vmatprep.subr.bf16.mxu0 %v642_v1  ;;  %363 = vmatprep.subr.bf16.mxu1 %v644_v2  ;;  %v648_v5 = vld [vmem:[#allocation5 + $0x24] ss:$16 sps:$4 sm:$0xff]   ;;  %v650_v6 = vld [vmem:[#allocation5 + $0x2c] ss:$16 sps:$4 sm:$0xff]   ;;  %v652_v7 = vld [vmem:[#allocation5 + $0x20] ss:$16 sps:$4 sm:$0xff]  }
  0x2a   :  { %291 = vmatpush1.bf16.msra.mxu0 %v646_v3  ;;  %364 = vmatpush1.bf16.msra.mxu1 %v647_v4  ;;  %v653_v8 = vld [vmem:[#allocation5 + $0x28] ss:$16 sps:$4 sm:$0xff]   ;;  %v654_v9 = vld [vmem:[#allocation5 + $0x44] ss:$16 sps:$4 sm:$0xff]   ;;  %v656_v10 = vld [vmem:[#allocation5 + $0x4c] ss:$16 sps:$4 sm:$0xff]  }
  0x2b   :  { %292 = vmatprep.subr.bf16.mxu0 %v648_v5  ;;  %365 = vmatprep.subr.bf16.mxu1 %v650_v6  ;;  %v658_v11 = vld [vmem:[#allocation5 + $0x40] ss:$16 sps:$4 sm:$0xff]   ;;  %v659_v12 = vld [vmem:[#allocation5 + $0x48] ss:$16 sps:$4 sm:$0xff]   ;;  %v660_v13 = vld [vmem:[#allocation5 + $0x64] ss:$16 sps:$4 sm:$0xff]  }
  0x2c   :  { %v662_v14 = vld [vmem:[#allocation5 + $0x6c] ss:$16 sps:$4 sm:$0xff]   ;;  %v664_v15 = vld [vmem:[#allocation5 + $0x60] ss:$16 sps:$4 sm:$0xff]   ;;  %v665_v16 = vld [vmem:[#allocation5 + $0x68] ss:$16 sps:$4 sm:$0xff]  }
  0x2d   :  { %v666_v17 = vld [vmem:[#allocation5 + $0x84] ss:$16 sps:$4 sm:$0xff]   ;;  %v668_v18 = vld [vmem:[#allocation5 + $0x8c] ss:$16 sps:$4 sm:$0xff]   ;;  %v670_v19 = vld [vmem:[#allocation5 + $0x80] ss:$16 sps:$4 sm:$0xff]  }
  0x2e   :  { %293 = vmatpush1.bf16.msra.mxu0 %v652_v7  ;;  %366 = vmatpush1.bf16.msra.mxu1 %v653_v8  ;;  %v671_v20 = vld [vmem:[#allocation5 + $0x88] ss:$16 sps:$4 sm:$0xff]   ;;  %v672_v21 = vld [vmem:[#allocation5 + $0xa4] ss:$16 sps:$4 sm:$0xff]   ;;  %v674_v22 = vld [vmem:[#allocation5 + $0xac] ss:$16 sps:$4 sm:$0xff]  }
  0x2f   :  { %294 = vmatprep.subr.bf16.mxu0 %v654_v9  ;;  %367 = vmatprep.subr.bf16.mxu1 %v656_v10  ;;  %v676_v23 = vld [vmem:[#allocation5 + $0xa0] ss:$16 sps:$4 sm:$0xff]   ;;  %v677_v24 = vld [vmem:[#allocation5 + $0xa8] ss:$16 sps:$4 sm:$0xff]   ;;  %v678_v25 = vld [vmem:[#allocation5 + $0xc4] ss:$16 sps:$4 sm:$0xff]  }
  0x30   :  { %v680_v26 = vld [vmem:[#allocation5 + $0xcc] ss:$16 sps:$4 sm:$0xff]   ;;  %v682_v27 = vld [vmem:[#allocation5 + $0xc0] ss:$16 sps:$4 sm:$0xff]   ;;  %v683_v28 = vld [vmem:[#allocation5 + $0xc8] ss:$16 sps:$4 sm:$0xff]  }
  0x31   :  { %v684_v29 = vld [vmem:[#allocation5 + $0xe4] ss:$16 sps:$4 sm:$0xff]   ;;  %v686_v30 = vld [vmem:[#allocation5 + $0xec] ss:$16 sps:$4 sm:$0xff]   ;;  %v688_v31 = vld [vmem:[#allocation5 + $0xe0] ss:$16 sps:$4 sm:$0xff]  }
  0x32   :  { %295 = vmatpush1.bf16.msra.mxu0 %v658_v11  ;;  %368 = vmatpush1.bf16.msra.mxu1 %v659_v12  ;;  %v689_v32 = vld [vmem:[#allocation5 + $0xe8] ss:$16 sps:$4 sm:$0xff]   ;;  %v690_v33 = vld [vmem:[#allocation2] sm:$0xff]   ;;  %v692_v35 = vld [vmem:[#allocation2 + $0x10] sm:$0xff]   ;;  %v87_v38 = vshrl.u32 %v86_v37, 7 }
  0x33   :  { %296 = vmatprep.subr.bf16.mxu0 %v660_v13  ;;  %369 = vmatprep.subr.bf16.mxu1 %v662_v14  ;;  %v693_v36 = vld [vmem:[#allocation2 + $0x18] sm:$0xff]   ;;  %v84_v41 = vld [vmem:[%s889_s2] sm:$0xf]  ;;  %s773_s2 = smov [#allocation7]  }
  0x34   :  { %v88_v39 = vsub.s32 0, %v87_v38  ;;  %v96_v40 = vsub.s32 2, %v87_v38  ;;  %v92_v42 = vsub.s32 1, %v87_v38  ;;  %v100_v43 = vsub.s32 3, %v87_v38  ;;  %s553_s13 = sshll.u32 %s773_s2, 4  ;;  %s554_s13 = int_to_ptr.vmem [resolvable:$true] %s553_s13 }
  0x35   :  { %s738_s14 = scalar_lea.vmem %s554_s13, 2048  ;;  %p743_p3 = scmp.lt.s32.totalorder %s554_s13, %s554_s13 }
  0x36   :  { %297 = vmatpush1.bf16.msra.mxu0 %v664_v15  ;;  %370 = vmatpush1.bf16.msra.mxu1 %v665_v16  ;;  %v832_v44 = vrot.slane %v84_v41, %v88_v39  ;;  %v834_v45 = vrot.slane %v84_v41, %v96_v40  ;;  %v836_v46 = vrot.slane %v84_v41, %v92_v42  ;;  %p739_p2 = scmp.ne.s32.totalorder %s554_s13, %s738_s14  ;;  %p744_p4 = scmp.lt.s32.totalorder %s738_s14, %s738_s14 }
  0x37   :  { %298 = vmatprep.subr.bf16.mxu0 %v666_v17  ;;  %371 = vmatprep.subr.bf16.mxu1 %v668_v18  ;;  %v838_v47 = vrot.slane %v84_v41, %v100_v43 }
  0x38   :  { %p745_p5 = por %p744_p4, %p743_p3 }
  0x3a   :  { %299 = vmatpush1.bf16.msra.mxu0 %v670_v19  ;;  %372 = vmatpush1.bf16.msra.mxu1 %v671_v20  ;;  %p746_p6 = pnand %p745_p5, %p739_p2 }
  0x3b   :  { %300 = vmatprep.subr.bf16.mxu0 %v672_v21  ;;  %373 = vmatprep.subr.bf16.mxu1 %v674_v22 }
  0x3e   :  { %301 = vmatpush1.bf16.msra.mxu0 %v676_v23  ;;  %374 = vmatpush1.bf16.msra.mxu1 %v677_v24 }
  0x3f   :  { %302 = vmatprep.subr.bf16.mxu0 %v678_v25  ;;  %375 = vmatprep.subr.bf16.mxu1 %v680_v26 }
  0x42   :  { %303 = vmatpush1.bf16.msra.mxu0 %v682_v27  ;;  %376 = vmatpush1.bf16.msra.mxu1 %v683_v28 }
  0x43   :  { %304 = vmatprep.subr.bf16.mxu0 %v684_v29  ;;  %377 = vmatprep.subr.bf16.mxu1 %v686_v30 }
  0x46   :  { %305 = vmatpush1.bf16.msra.mxu0 %v688_v31  ;;  %378 = vmatpush1.bf16.msra.mxu1 %v689_v32 }
  0x49   :  { %323 = vmatmul.mubr.bf16.vlgmr.msra.gmra.mrb[0].mxu0 %v690_v33  ;;  %396 = vmatmul.mubr.bf16.vlgmr.msra.gmra.mrb[0].mxu1 %v690_v33 }
  0x4a   :  { %332 = vmatprep.mubr.bf16.mxu0 %v772_v0  ;;  %405 = vmatprep.mubr.bf16.mxu1 %v772_v0 }
  0x51   :  { %333 = vmatmul.mubr.bf16.gmra.mrb[4].mxu0 %v691_v34  ;;  %406 = vmatmul.mubr.bf16.gmra.mrb[4].mxu1 %v691_v34 }
  0x52   :  { %342 = vmatprep.mubr.bf16.mxu0 %v772_v0  ;;  %415 = vmatprep.mubr.bf16.mxu1 %v772_v0 }
  0x59   :  { %343 = vmatmul.mubr.bf16.gmra.mrb[8].mxu0 %v692_v35  ;;  %416 = vmatmul.mubr.bf16.gmra.mrb[8].mxu1 %v692_v35 }
  0x5a   :  { %352 = vmatprep.mubr.bf16.mxu0 %v772_v0  ;;  %425 = vmatprep.mubr.bf16.mxu1 %v772_v0 }
  0x61   :  { %353 = vmatmul.mubr.bf16.gmra.mrb[12].mxu0 %v693_v36  ;;  %426 = vmatmul.mubr.bf16.gmra.mrb[12].mxu1 %v693_v36 }
 0x11c   :  { %v324_v48 = vpop.f32.mrb[0].mxu0  ;;  %v397_v49 = vpop.f32.mrb[0].mxu1 }
 0x11d   :  { %v325_v50 = vadd.f32 %v324_v48, %v832_v44  ;;  %v398_v51 = vadd.f32 %v397_v49, %v834_v45  ;;  %v326_v52 = vpop.f32.mrb[1].mxu0  ;;  %v399_v53 = vpop.f32.mrb[1].mxu1 }
 0x11e   :  { %v327_v54 = vadd.f32 %v326_v52, %v836_v46  ;;  %v400_v55 = vadd.f32 %v399_v53, %v838_v47  ;;  %v328_v56 = vpop.f32.mrb[2].mxu0  ;;  %v401_v57 = vpop.f32.mrb[2].mxu1 }
 0x11f   :  { %v329_v58 = vadd.f32 %v328_v56, %v832_v44  ;;  %v402_v59 = vadd.f32 %v401_v57, %v834_v45  ;;  %v330_v60 = vpop.f32.mrb[3].mxu0  ;;  %v403_v61 = vpop.f32.mrb[3].mxu1 }
 0x120   :  { %v618_v62 = vpack.c.bf16 %v327_v54, %v325_v50  ;;  %v619_v63 = vpack.c.bf16 %v400_v55, %v398_v51  ;;  %v331_v0 = vadd.f32 %v330_v60, %v836_v46  ;;  %v404_v1 = vadd.f32 %v403_v61, %v838_v47 }
 0x122   :  { %532 = vst [vmem:[#allocation7] sm:$0xff] %v618_v62  ;;  %533 = vst [vmem:[#allocation7 + $0x8] sm:$0xff] %v619_v63  ;;  %v620_v2 = vpack.c.bf16 %v331_v0, %v329_v58  ;;  %v621_v3 = vpack.c.bf16 %v404_v1, %v402_v59 }
 0x124   :  { %534 = vst [vmem:[#allocation7 + $0x10] sm:$0xff] %v620_v2  ;;  %535 = vst [vmem:[#allocation7 + $0x18] sm:$0xff] %v621_v3  ;;  %v334_v4 = vpop.f32.mrb[4].mxu0  ;;  %v407_v5 = vpop.f32.mrb[4].mxu1 }
 0x125   :  { %v335_v6 = vadd.f32 %v334_v4, %v832_v44  ;;  %v408_v7 = vadd.f32 %v407_v5, %v834_v45  ;;  %v336_v8 = vpop.f32.mrb[5].mxu0  ;;  %v409_v9 = vpop.f32.mrb[5].mxu1 }
 0x126   :  { %v337_v10 = vadd.f32 %v336_v8, %v836_v46  ;;  %v410_v11 = vadd.f32 %v409_v9, %v838_v47  ;;  %v338_v12 = vpop.f32.mrb[6].mxu0  ;;  %v411_v13 = vpop.f32.mrb[6].mxu1 }
 0x127   :  { %v339_v14 = vadd.f32 %v338_v12, %v832_v44  ;;  %v412_v15 = vadd.f32 %v411_v13, %v834_v45  ;;  %v340_v16 = vpop.f32.mrb[7].mxu0  ;;  %v413_v17 = vpop.f32.mrb[7].mxu1 }
 0x128   :  { %v622_v18 = vpack.c.bf16 %v337_v10, %v335_v6  ;;  %v623_v19 = vpack.c.bf16 %v410_v11, %v408_v7  ;;  %v341_v20 = vadd.f32 %v340_v16, %v836_v46  ;;  %v414_v21 = vadd.f32 %v413_v17, %v838_v47 }
 0x12a   :  { %536 = vst [vmem:[#allocation7 + $0x20] sm:$0xff] %v622_v18  ;;  %537 = vst [vmem:[#allocation7 + $0x28] sm:$0xff] %v623_v19  ;;  %v624_v22 = vpack.c.bf16 %v341_v20, %v339_v14  ;;  %v625_v23 = vpack.c.bf16 %v414_v21, %v412_v15 }
 0x12c   :  { %538 = vst [vmem:[#allocation7 + $0x30] sm:$0xff] %v624_v22  ;;  %539 = vst [vmem:[#allocation7 + $0x38] sm:$0xff] %v625_v23  ;;  %v344_v24 = vpop.f32.mrb[8].mxu0  ;;  %v417_v25 = vpop.f32.mrb[8].mxu1 }
 0x12d   :  { %v345_v26 = vadd.f32 %v344_v24, %v832_v44  ;;  %v418_v27 = vadd.f32 %v417_v25, %v834_v45  ;;  %v346_v28 = vpop.f32.mrb[9].mxu0  ;;  %v419_v29 = vpop.f32.mrb[9].mxu1 }
 0x12e   :  { %v347_v30 = vadd.f32 %v346_v28, %v836_v46  ;;  %v420_v31 = vadd.f32 %v419_v29, %v838_v47  ;;  %v348_v32 = vpop.f32.mrb[10].mxu0  ;;  %v421_v33 = vpop.f32.mrb[10].mxu1 }
 0x12f   :  { %v349_v34 = vadd.f32 %v348_v32, %v832_v44  ;;  %v422_v35 = vadd.f32 %v421_v33, %v834_v45  ;;  %v350_v36 = vpop.f32.mrb[11].mxu0  ;;  %v423_v37 = vpop.f32.mrb[11].mxu1 }
 0x130   :  { %v626_v38 = vpack.c.bf16 %v347_v30, %v345_v26  ;;  %v627_v39 = vpack.c.bf16 %v420_v31, %v418_v27  ;;  %v351_v40 = vadd.f32 %v350_v36, %v836_v46  ;;  %v424_v41 = vadd.f32 %v423_v37, %v838_v47 }
 0x132   :  { %540 = vst [vmem:[#allocation7 + $0x40] sm:$0xff] %v626_v38  ;;  %541 = vst [vmem:[#allocation7 + $0x48] sm:$0xff] %v627_v39  ;;  %v628_v42 = vpack.c.bf16 %v351_v40, %v349_v34  ;;  %v629_v43 = vpack.c.bf16 %v424_v41, %v422_v35 }
 0x134   :  { %542 = vst [vmem:[#allocation7 + $0x50] sm:$0xff] %v628_v42  ;;  %543 = vst [vmem:[#allocation7 + $0x58] sm:$0xff] %v629_v43  ;;  %v354_v48 = vpop.f32.mrb[12].mxu0  ;;  %v427_v49 = vpop.f32.mrb[12].mxu1 }
 0x135   :  { %v355_v50 = vadd.f32 %v354_v48, %v832_v44  ;;  %v428_v51 = vadd.f32 %v427_v49, %v834_v45  ;;  %v356_v52 = vpop.f32.mrb[13].mxu0  ;;  %v429_v53 = vpop.f32.mrb[13].mxu1 }
 0x136   :  { %v357_v54 = vadd.f32 %v356_v52, %v836_v46  ;;  %v430_v55 = vadd.f32 %v429_v53, %v838_v47  ;;  %v358_v56 = vpop.f32.mrb[14].mxu0  ;;  %v431_v57 = vpop.f32.mrb[14].mxu1 }
 0x137   :  { %v359_v58 = vadd.f32 %v358_v56, %v832_v44  ;;  %v432_v59 = vadd.f32 %v431_v57, %v834_v45  ;;  %v360_v60 = vpop.f32.mrb[15].mxu0  ;;  %v433_v61 = vpop.f32.mrb[15].mxu1 }
 0x138   :  { %v630_v62 = vpack.c.bf16 %v357_v54, %v355_v50  ;;  %v631_v63 = vpack.c.bf16 %v430_v55, %v428_v51  ;;  %v361_v0 = vadd.f32 %v360_v60, %v836_v46  ;;  %v434_v1 = vadd.f32 %v433_v61, %v838_v47 }
 0x13a   :  { %544 = vst [vmem:[#allocation7 + $0x60] sm:$0xff] %v630_v62  ;;  %545 = vst [vmem:[#allocation7 + $0x68] sm:$0xff] %v631_v63  ;;  %v632_v2 = vpack.c.bf16 %v361_v0, %v359_v58  ;;  %v633_v3 = vpack.c.bf16 %v434_v1, %v432_v59 }
 0x13c   :  { %546 = vst [vmem:[#allocation7 + $0x70] sm:$0xff] %v632_v2  ;;  %547 = vst [vmem:[#allocation7 + $0x78] sm:$0xff] %v633_v3 }
 0x13d   :  { %749 = shalt.err (!%p746_p6)
}
 0x13e   :  { %s750_s17 = scalar_lea.hbm %s890_s3, 2048 }
 0x13f   :  { %p751_p7 = scmp.ne.s32.totalorder %s890_s3, %s750_s17  ;;  %p754_p8 = scmp.lt.u32.totalorder %s750_s17, %s890_s3 }
 0x141   :  { %p756_p9 = pnand %p754_p8, %p751_p7 }
 0x143   :  { %759 = shalt.err (!%p756_p9)
}
 0x144   :  { %559 = dma.vmem_to_hbm [thread:$0]  %s554_s13, 2048, %s890_s3, [#allocation4], %s770_s0, %s770_s0, %s771_s9  }
 0x145   :  { %764 = dma.done.wait [#allocation4], 2048  }
 0x146   :  { %765 = vsyncadd [#allocation4], 4294965248 }
 0x147   :  { %563 = vsyncpa [#allocation3], 1 }
 0x148   :  { %564 = vsyncpa [#allocation6], 1 }
 0x149   :  { %565 = vsyncpa [#allocation4], 1 }

</bundles_post_ra>
